<compile_context>
chip_gen: v6e
topology: v6e:2x2x1
jax: 0.10.0
libtpu: 0.0.40
codegen_flags: <defaults>
</compile_context>

<pallas_src>
import jax
import jax.numpy as jnp
from jax.experimental import pallas as pl
from jax.experimental.pallas import tpu as pltpu

KERNEL_SIZE = 3
PADDING = 1
ALIGN = 16  # sublane alignment for the packed bf16 scratch window


def _glu_conv_kernel(x_ref, halo_ref, w_ref, b_ref, o_ref, xw_ref):
    # x_ref:    (1, TL, Dp)         current sequence tile (input dtype)
    # halo_ref: (1, 1, 2, Dp)       row 0: x[t0-1], row 1: x[t0+TL] (zeros at seq ends)
    # w_ref:    (K, Dp, 2*Dp)       bf16 fused out|gate weight slab (single-buffered)
    # b_ref:    (1, 2*Dp)           f32 fused bias
    # o_ref:    (1, TL, Dp)         gated output tile
    # xw_ref:   (TL + 2*ALIGN, Dp)  bf16 scratch: halo'd window, body at aligned row ALIGN
    TL = o_ref.shape[1]
    Dp = o_ref.shape[2]

    # Assemble the halo'd window in bf16 (MXU-native; halves scratch store traffic).
    xw_ref[ALIGN:ALIGN + TL, :] = x_ref[0].astype(jnp.bfloat16)  # aligned body store
    halo = halo_ref[0, 0].astype(jnp.bfloat16)                   # (2, Dp)
    xw_ref[ALIGN - 1:ALIGN, :] = halo[0:1, :]                    # x[t0 - 1]
    xw_ref[ALIGN + TL:ALIGN + TL + 1, :] = halo[1:2, :]          # x[t0 + TL]

    # Bias folded into the accumulator init (single hoisted broadcast).
    acc = jnp.broadcast_to(b_ref[...], (TL, 2 * Dp)).astype(jnp.float32)

    # k=3 conv == 3 shifted matmuls; out|gate halves fused into one (Dp, 2Dp) RHS.
    for k in range(KERNEL_SIZE):
        lo = ALIGN - PADDING + k
        xs = xw_ref[lo:lo + TL, :]                               # (TL, Dp) bf16
        acc = acc + jnp.dot(xs, w_ref[k], preferred_element_type=jnp.float32)

    out = acc[:, :Dp]
    gate = acc[:, Dp:]
    # GLU epilogue fused in-kernel (sigmoid -> EUP, gating multiply -> VPU).
    o_ref[0] = (out * jax.nn.sigmoid(gate)).astype(o_ref.dtype)


def _vmem_capacity_bytes():
    """Physical per-core VMEM (128 MiB on v5e/v6e, 64 MiB on v7x)."""
    try:
        return int(pltpu.get_tpu_info().vmem_capacity_bytes)
    except Exception:
        return 128 * (1 << 20)


def _pick_tile_l(L, per_row_bytes, fixed_bytes, budget_bytes):
    """Largest divisor of L (preferring multiples of 8) within the VMEM budget."""
    avail = max(budget_bytes - fixed_bytes, 2 * (1 << 20))
    max_rows = max(8, avail // max(per_row_bytes, 1))
    cap_rows = 1024 if budget_bytes >= 64 * (1 << 20) else 512
    cap = int(min(L, cap_rows, max_rows))
    best = None
    for tl in range(8, cap + 1, 8):          # multiple-of-8 divisors first
        if L % tl == 0:
            best = tl
    if best is None:
        for tl in range(cap, 7, -1):         # any divisor >= 8 under the cap
            if L % tl == 0:
                best = tl
                break
    # TODO(synk): awkward (e.g. prime) L falls back to one full-length tile,
    # which can exceed the budget for very long sequences.
    return best if best is not None else L


def gated_convolution(x, weight, bias, *, tile_l=None):
    """x: (B, L, D) f32; weight: (2D, D, K) (PyTorch Conv1d layout); bias: (2D,)."""
    B, L, D = x.shape
    assert weight.shape == (2 * D, D, KERNEL_SIZE)
    assert bias.shape == (2 * D,)

    # Pad channel dim to a lane-dense multiple of 128 (unmasked vst, full MXU tiles).
    Dp = max(128, ((D + 127) // 128) * 128)
    pad_d = Dp - D
    x_p = jnp.pad(x, ((0, 0), (0, 0), (0, pad_d))) if pad_d else x

    # Fused bf16 weight slab: w[k, c_in, c_out_fused], out half then gate half.
    w = jnp.transpose(weight, (2, 1, 0))                     # (K, D, 2D)
    w_out, w_gate = w[:, :, :D], w[:, :, D:]                 # (K, D, D) each
    if pad_d:
        w_out = jnp.pad(w_out, ((0, 0), (0, pad_d), (0, pad_d)))
        w_gate = jnp.pad(w_gate, ((0, 0), (0, pad_d), (0, pad_d)))
    w_fused = jnp.concatenate([w_out, w_gate], axis=2).astype(jnp.bfloat16)  # (K, Dp, 2Dp)

    b_out, b_gate = bias[:D], bias[D:]
    if pad_d:
        zpad = jnp.zeros((pad_d,), bias.dtype)
        b_out = jnp.concatenate([b_out, zpad])
        b_gate = jnp.concatenate([b_gate, zpad])
    b_fused = jnp.concatenate([b_out, b_gate]).reshape(1, 2 * Dp).astype(jnp.float32)

    # Generation-aware VMEM budget and tile size.
    x_sz = jnp.dtype(x.dtype).itemsize
    o_sz = x_sz
    capacity = _vmem_capacity_bytes()
    budget = (3 * capacity) // 4                    # ~48 MiB v7x, ~96 MiB v5e/v6e
    weight_bytes = KERNEL_SIZE * Dp * (2 * Dp) * 2  # bf16 slab, single-buffered
    fixed = (weight_bytes
             + 2 * (2 * Dp * x_sz)                  # halo rows (double-buffered)
             + 2 * Dp * 4                           # bias
             + 2 * ALIGN * Dp * 2)                  # scratch alignment padding
    per_row = (2 * Dp * x_sz                        # x tile (double-buffered)
               + 2 * Dp * o_sz                      # out tile (double-buffered)
               + Dp * 2                             # bf16 scratch window
               + 2 * Dp * 4                         # f32 (TL, 2Dp) accumulator
               + 2 * Dp * 4)                        # epilogue temporaries headroom
    TL = _pick_tile_l(L, per_row, fixed, budget) if tile_l is None else int(tile_l)
    assert L % TL == 0, f"tile_l={TL} must divide L={L}"
    NT = L // TL

    # Tiny halo tensor instead of padding x along the sequence in HBM:
    #   halo[b, i, 0] = x[b, i*TL - 1]   (zero for i == 0)
    #   halo[b, i, 1] = x[b, (i+1)*TL]   (zero for i == NT-1)
    zero_row = jnp.zeros((B, 1, Dp), x_p.dtype)
    if NT > 1:
        left_rows = x_p[:, TL - 1:L - 1:TL, :]
        right_rows = x_p[:, TL:L:TL, :]
        left = jnp.concatenate([zero_row, left_rows], axis=1)
        right = jnp.concatenate([right_rows, zero_row], axis=1)
    else:
        left, right = zero_row, zero_row
    halo = jnp.stack([left, right], axis=2)          # (B, NT, 2, Dp)

    need = fixed + TL * per_row
    vmem_limit = int(max(need + (4 << 20), 16 << 20))
    vmem_limit = int(min(vmem_limit, max(capacity - (8 << 20), 16 << 20)))

    flops = 2 * B * L * (KERNEL_SIZE * Dp) * (2 * Dp)
    bytes_accessed = int(x_p.size * x_sz + halo.size * x_sz + w_fused.size * 2
                         + b_fused.size * 4 + B * L * Dp * o_sz)

    out_p = pl.pallas_call(
        _glu_conv_kernel,
        out_shape=jax.ShapeDtypeStruct((B, L, Dp), x.dtype),
        grid_spec=pltpu.PrefetchScalarGridSpec(
            num_scalar_prefetch=0,
            grid=(B, NT),
            in_specs=[
                pl.BlockSpec((1, TL, Dp), lambda b, i: (b, i, 0)),
                pl.BlockSpec((1, 1, 2, Dp), lambda b, i: (b, i, 0, 0)),
                # Grid-invariant operands: constant index map + single buffering
                # (no duplicate VMEM copy; matters most at large Dp on v7x).
                pl.BlockSpec((KERNEL_SIZE, Dp, 2 * Dp), lambda b, i: (0, 0, 0),
                             pipeline_mode=pl.Buffered(1)),
                pl.BlockSpec((1, 2 * Dp), lambda b, i: (0, 0),
                             pipeline_mode=pl.Buffered(1)),
            ],
            out_specs=pl.BlockSpec((1, TL, Dp), lambda b, i: (b, i, 0)),
            scratch_shapes=[pltpu.VMEM((TL + 2 * ALIGN, Dp), jnp.bfloat16)],
        ),
        compiler_params=pltpu.CompilerParams(
            # TODO(synk): on v7x consider pltpu.CORE_PARALLEL on the batch axis
            # (2 TCs/chip) and an output-channel tiling grid axis for D >= ~1024.
            dimension_semantics=("parallel", "parallel"),
            vmem_limit_bytes=vmem_limit,
        ),
        cost_estimate=pl.CostEstimate(
            flops=flops,
            transcendentals=B * L * Dp,
            bytes_accessed=bytes_accessed,
        ),
    )(x_p, halo, w_fused, b_fused)

    return out_p[:, :, :D] if pad_d else out_p


def _reference(x, weight, bias):
    """Pure-JAX f32 reference matching the PyTorch forward."""
    B, L, D = x.shape
    w = jnp.transpose(weight, (2, 1, 0))  # (K, D, 2D)
    x_pad = jnp.pad(x, ((0, 0), (PADDING, PADDING), (0, 0)))
    conv = jnp.zeros((B, L, 2 * D), jnp.float32)
    for k in range(KERNEL_SIZE):
        conv = conv + jnp.einsum("blc,co->blo", x_pad[:, k:k + L, :], w[k])
    conv = conv + bias[None, None, :]
    out, gate = conv[..., :D], conv[..., D:]
    return out * jax.nn.sigmoid(gate)


def _make_params(D, kw, kb):
    # Conv1d weight (2D, D, K) with xavier_uniform_ (gain=1); bias default init.
    fan_in = D * KERNEL_SIZE
    fan_out = 2 * D * KERNEL_SIZE
    bound = (6.0 / (fan_in + fan_out)) ** 0.5
    weight = jax.random.uniform(
        kw, (2 * D, D, KERNEL_SIZE), minval=-bound, maxval=bound, dtype=jnp.float32)
    b_bound = 1.0 / (fan_in ** 0.5)
    bias = jax.random.uniform(
        kb, (2 * D,), minval=-b_bound, maxval=b_bound, dtype=jnp.float32)
    return weight, bias


if __name__ == "__main__":
    key = jax.random.PRNGKey(0)
    kx, kw, kb, kx2, kw2, kb2 = jax.random.split(key, 6)

    # Case 1: small d_model not a multiple of 128 (exercises the channel-pad path).
    B, L, D = 2, 16, 32
    x = jax.random.normal(kx, (B, L, D), dtype=jnp.float32)
    weight, bias = _make_params(D, kw, kb)
    y_ref = _reference(x, weight, bias)
    y = gated_convolution(x, weight, bias)
    jax.block_until_ready(y)
    assert y.shape == (B, L, D)
    assert jnp.allclose(y, y_ref, atol=3e-2, rtol=3e-2), "mismatch vs reference (pad path)"

    # Case 2: lane-dense d_model, multiple sequence tiles (exercises the halo path).
    B2, L2, D2 = 2, 32, 128
    x2 = jax.random.normal(kx2, (B2, L2, D2), dtype=jnp.float32)
    weight2, bias2 = _make_params(D2, kw2, kb2)
    y2_ref = _reference(x2, weight2, bias2)
    y2 = gated_convolution(x2, weight2, bias2, tile_l=8)
    jax.block_until_ready(y2)
    assert jnp.allclose(y2, y2_ref, atol=3e-2, rtol=3e-2), "mismatch vs reference (halo path)"

    print("KERNEL_OK")
</pallas_src>

<mosaic_0001>
module attributes {stable_mosaic.version = 11 : i64} {
  func.func @_glu_conv_kernel(%arg0: i32, %arg1: i32, %arg2: memref<1x16x128xf32, #tpu.memory_space<vmem>>, %arg3: memref<1x1x2x128xf32, #tpu.memory_space<vmem>>, %arg4: memref<3x128x256xbf16, #tpu.memory_space<vmem>>, %arg5: memref<1x256xf32, #tpu.memory_space<vmem>>, %arg6: memref<1x16x128xf32, #tpu.memory_space<vmem>>, %arg7: memref<48x128xbf16, #tpu.memory_space<vmem>>) attributes {dimension_semantics = [#tpu.dimension_semantics<parallel>, #tpu.dimension_semantics<parallel>], iteration_bounds = array<i64: 2, 1>, scalar_prefetch = 0 : i64, scratch_operands = 1 : i64, tpu.core_type = #tpu.core_type<tc>, window_params = [{transform_indices = @transform_0, window_bounds = array<i64: 1, 16, 128>}, {transform_indices = @transform_1, window_bounds = array<i64: 1, 1, 2, 128>}, {pipeline_mode = #tpu.pipeline_mode<synchronous>, transform_indices = @transform_2, window_bounds = array<i64: 3, 128, 256>}, {pipeline_mode = #tpu.pipeline_mode<synchronous>, transform_indices = @transform_3, window_bounds = array<i64: 1, 256>}, {transform_indices = @transform_4, window_bounds = array<i64: 1, 16, 128>}]} {
    %c0 = arith.constant 0 : index
    %c0_0 = arith.constant 0 : index
    %c0_1 = arith.constant 0 : index
    %0 = vector.load %arg2[%c0, %c0_0, %c0_1] : memref<1x16x128xf32, #tpu.memory_space<vmem>>, vector<1x16x128xf32>
    %1 = vector.shape_cast %0 : vector<1x16x128xf32> to vector<16x128xf32>
    %2 = arith.truncf %1 : vector<16x128xf32> to vector<16x128xbf16>
    %c16 = arith.constant 16 : index
    %c0_2 = arith.constant 0 : index
    %3 = vector.load %arg7[%c16, %c0_2] : memref<48x128xbf16, #tpu.memory_space<vmem>>, vector<16x128xbf16>
    tpu.vector_store %arg7[%c16, %c0_2], %2 {strides = array<i32>} : memref<48x128xbf16, #tpu.memory_space<vmem>>, vector<16x128xbf16>,
    %c0_3 = arith.constant 0 : index
    %c0_4 = arith.constant 0 : index
    %c0_5 = arith.constant 0 : index
    %c0_6 = arith.constant 0 : index
    %4 = vector.load %arg3[%c0_3, %c0_4, %c0_5, %c0_6] : memref<1x1x2x128xf32, #tpu.memory_space<vmem>>, vector<1x1x2x128xf32>
    %5 = vector.shape_cast %4 : vector<1x1x2x128xf32> to vector<2x128xf32>
    %6 = arith.truncf %5 : vector<2x128xf32> to vector<2x128xbf16>
    %7 = vector.extract_strided_slice %6 {offsets = [0, 0], sizes = [1, 128], strides = [1, 1]} : vector<2x128xbf16> to vector<1x128xbf16>
    %c15 = arith.constant 15 : index
    %c0_7 = arith.constant 0 : index
    %8 = vector.load %arg7[%c15, %c0_7] : memref<48x128xbf16, #tpu.memory_space<vmem>>, vector<1x128xbf16>
    tpu.vector_store %arg7[%c15, %c0_7], %7 {strides = array<i32>} : memref<48x128xbf16, #tpu.memory_space<vmem>>, vector<1x128xbf16>,
    %9 = vector.extract_strided_slice %6 {offsets = [1, 0], sizes = [1, 128], strides = [1, 1]} : vector<2x128xbf16> to vector<1x128xbf16>
    %c32 = arith.constant 32 : index
    %c0_8 = arith.constant 0 : index
    %10 = vector.load %arg7[%c32, %c0_8] : memref<48x128xbf16, #tpu.memory_space<vmem>>, vector<1x128xbf16>
    tpu.vector_store %arg7[%c32, %c0_8], %9 {strides = array<i32>} : memref<48x128xbf16, #tpu.memory_space<vmem>>, vector<1x128xbf16>,
    %c0_9 = arith.constant 0 : index
    %c0_10 = arith.constant 0 : index
    %11 = vector.load %arg5[%c0_9, %c0_10] : memref<1x256xf32, #tpu.memory_space<vmem>>, vector<1x256xf32>
    %12 = vector.shape_cast %11 : vector<1x256xf32> to vector<1x256xf32>
    %13 = vector.broadcast %12 : vector<1x256xf32> to vector<16x256xf32>
    %c15_11 = arith.constant 15 : index
    %c0_12 = arith.constant 0 : index
    %14 = vector.load %arg7[%c15_11, %c0_12] : memref<48x128xbf16, #tpu.memory_space<vmem>>, vector<16x128xbf16>
    %c0_13 = arith.constant 0 : index
    %c0_14 = arith.constant 0 : index
    %c0_15 = arith.constant 0 : index
    %15 = vector.load %arg4[%c0_13, %c0_14, %c0_15] : memref<3x128x256xbf16, #tpu.memory_space<vmem>>, vector<1x128x256xbf16>
    %16 = vector.shape_cast %15 : vector<1x128x256xbf16> to vector<128x256xbf16>
    %cst = arith.constant dense<0.000000e+00> : vector<16x256xf32>
    %17 = tpu.matmul %14, %16, %cst {dimension_numbers = #tpu.dot_dimension_numbers<[1], [0], [0], [1], [0, 0, 1, 1], [], []>} : vector<16x128xbf16>, vector<128x256xbf16>, vector<16x256xf32> -> vector<16x256xf32>
    %18 = arith.addf %13, %17 : vector<16x256xf32>
    %c16_16 = arith.constant 16 : index
    %c0_17 = arith.constant 0 : index
    %19 = vector.load %arg7[%c16_16, %c0_17] : memref<48x128xbf16, #tpu.memory_space<vmem>>, vector<16x128xbf16>
    %c1 = arith.constant 1 : index
    %c0_18 = arith.constant 0 : index
    %c0_19 = arith.constant 0 : index
    %20 = vector.load %arg4[%c1, %c0_18, %c0_19] : memref<3x128x256xbf16, #tpu.memory_space<vmem>>, vector<1x128x256xbf16>
    %21 = vector.shape_cast %20 : vector<1x128x256xbf16> to vector<128x256xbf16>
    %cst_20 = arith.constant dense<0.000000e+00> : vector<16x256xf32>
    %22 = tpu.matmul %19, %21, %cst_20 {dimension_numbers = #tpu.dot_dimension_numbers<[1], [0], [0], [1], [0, 0, 1, 1], [], []>} : vector<16x128xbf16>, vector<128x256xbf16>, vector<16x256xf32> -> vector<16x256xf32>
    %23 = arith.addf %18, %22 : vector<16x256xf32>
    %c17 = arith.constant 17 : index
    %c0_21 = arith.constant 0 : index
    %24 = vector.load %arg7[%c17, %c0_21] : memref<48x128xbf16, #tpu.memory_space<vmem>>, vector<16x128xbf16>
    %c2 = arith.constant 2 : index
    %c0_22 = arith.constant 0 : index
    %c0_23 = arith.constant 0 : index
    %25 = vector.load %arg4[%c2, %c0_22, %c0_23] : memref<3x128x256xbf16, #tpu.memory_space<vmem>>, vector<1x128x256xbf16>
    %26 = vector.shape_cast %25 : vector<1x128x256xbf16> to vector<128x256xbf16>
    %cst_24 = arith.constant dense<0.000000e+00> : vector<16x256xf32>
    %27 = tpu.matmul %24, %26, %cst_24 {dimension_numbers = #tpu.dot_dimension_numbers<[1], [0], [0], [1], [0, 0, 1, 1], [], []>} : vector<16x128xbf16>, vector<128x256xbf16>, vector<16x256xf32> -> vector<16x256xf32>
    %28 = arith.addf %23, %27 : vector<16x256xf32>
    %29 = vector.extract_strided_slice %28 {offsets = [0, 0], sizes = [16, 128], strides = [1, 1]} : vector<16x256xf32> to vector<16x128xf32>
    %30 = vector.extract_strided_slice %28 {offsets = [0, 128], sizes = [16, 128], strides = [1, 1]} : vector<16x256xf32> to vector<16x128xf32>
    %31 = arith.negf %30 : vector<16x128xf32>
    %32 = math.exp %31 : vector<16x128xf32>
    %cst_25 = arith.constant 1.000000e+00 : f32
    %33 = vector.broadcast %cst_25 : f32 to vector<16x128xf32>
    %34 = arith.addf %33, %32 : vector<16x128xf32>
    %35 = arith.divf %33, %34 : vector<16x128xf32>
    %36 = arith.mulf %29, %35 : vector<16x128xf32>
    %c0_26 = arith.constant 0 : index
    %c0_27 = arith.constant 0 : index
    %c0_28 = arith.constant 0 : index
    %37 = vector.load %arg6[%c0_26, %c0_27, %c0_28] : memref<1x16x128xf32, #tpu.memory_space<vmem>>, vector<1x16x128xf32>
    %38 = vector.shape_cast %37 : vector<1x16x128xf32> to vector<16x128xf32>
    %39 = vector.shape_cast %36 : vector<16x128xf32> to vector<1x16x128xf32>
    tpu.vector_store %arg6[%c0_26, %c0_27, %c0_28], %39 {strides = array<i32>} : memref<1x16x128xf32, #tpu.memory_space<vmem>>, vector<1x16x128xf32>,
    return
  }
  func.func @transform_0(%arg0: i32, %arg1: i32) -> (i32, i32, i32) {
    %c0_i32 = arith.constant 0 : i32
    %c0_i32_0 = arith.constant 0 : i32
    return %arg0, %arg1, %c0_i32 : i32, i32, i32
  }
  func.func @transform_1(%arg0: i32, %arg1: i32) -> (i32, i32, i32, i32) {
    %c0_i32 = arith.constant 0 : i32
    %c0_i32_0 = arith.constant 0 : i32
    %c0_i32_1 = arith.constant 0 : i32
    return %arg0, %arg1, %c0_i32, %c0_i32_0 : i32, i32, i32, i32
  }
  func.func @transform_2(%arg0: i32, %arg1: i32) -> (i32, i32, i32) {
    %c0_i32 = arith.constant 0 : i32
    %c0_i32_0 = arith.constant 0 : i32
    %c0_i32_1 = arith.constant 0 : i32
    %c0_i32_2 = arith.constant 0 : i32
    return %c0_i32, %c0_i32_0, %c0_i32_1 : i32, i32, i32
  }
  func.func @transform_3(%arg0: i32, %arg1: i32) -> (i32, i32) {
    %c0_i32 = arith.constant 0 : i32
    %c0_i32_0 = arith.constant 0 : i32
    %c0_i32_1 = arith.constant 0 : i32
    return %c0_i32, %c0_i32_0 : i32, i32
  }
  func.func @transform_4(%arg0: i32, %arg1: i32) -> (i32, i32, i32) {
    %c0_i32 = arith.constant 0 : i32
    %c0_i32_0 = arith.constant 0 : i32
    return %arg0, %arg1, %c0_i32 : i32, i32, i32
  }
}

</mosaic_0001>

<bundles_post_ra>
// kernel: tpu_custom_call.1
= control target key start
LH: loop header
LB: loop body
LE: loop exit
PB: predicated region body
PF: predicated region fallthrough
CT: control target
= control target key end

     0   :  { %s1677_s0 = inlined_call_operand.hbm [shape: f32[2,16,128], index: 0, kind: input, shape index: {}]   ;;  %s1678_s1 = inlined_call_operand.hbm [shape: f32[2,1,2,128], index: 1, kind: input, shape index: {}]   ;;  %s1679_s2 = inlined_call_operand.hbm [shape: bf16[3,128,256], index: 2, kind: input, shape index: {}]   ;;  %s1680_s3 = inlined_call_operand.vmem [shape: f32[1,256], index: 3, kind: input, shape index: {}]   ;;  %s1681_s4 = inlined_call_operand.hbm [shape: f32[2,16,128], index: 4, kind: output, shape index: {}]  }
   0x1   :  { %1688 = sst [smem:[#allocation18_spill]] %s1677_s0 }
   0x2   :  { %1689 = sst [smem:[#allocation19_spill]] %s1679_s2 }
   0x3   :  { %9 = vsyncpa [#allocation4], 0 }
   0x4   :  { %11 = vsyncpa [#allocation4 + $0x1], 0 }
   0x5   :  { %12 = vsyncpa [#allocation7], 0 }
   0x6   :  { %14 = vsyncpa [#allocation7 + $0x1], 0 }
   0x7   :  { %15 = vsyncpa [#allocation5], 0 }
   0x8   :  { %17 = vsyncpa [#allocation5 + $0x1], 0  ;;  %s1446_s15 = smov 0   ;;  %s1448_s16 = smov 0  }
   0x9   :  { %s1450_s17 = smov 0   ;;  %s1452_s18 = smov 0  }
   0xa   :  { %s1454_s19 = smov 0   ;;  %s1456_s20 = smov 0  }
   0xb LB: > { %1690 = sst [smem:[#allocation14_spill]] %s1398_s17  ;;  %s1477_s21 = sadd.s32 4294967295, %s1410_s20   ;;  %s1410_s20 = sphi %s1456_s20, %s23_s20   ;;  %s1406_s19 = sphi %s1454_s19, %s1716_s19   ;;  %s1402_s18 = sphi %s1452_s18, %s1715_s18   ;;  %s1398_s17 = sphi %s1450_s17, %s1711_s17   ;;  %s1394_s16 = sphi %s1448_s16, %s1714_s16   ;;  %s1390_s15 = sphi %s1446_s15, %s1713_s15  }
   0xc   : > { %1691 = sst [smem:[#allocation15_spill]] %s1410_s20  ;;  %s983_s22 = sadd.s32 4294967294, %s1410_s20  }
   0xd   : > { %p57_p0 = scmp.ne.s32.totalorder %s1394_s16, %s1390_s15  ;;  %p58_p1 = scmp.eq.s32.totalorder %s1477_s21, 0 }
   0xe   : > { %p159_p3 = scmp.eq.s32.totalorder %s983_s22, 1  ;;  %p984_p5 = scmp.ge.s32.totalorder %s1410_s20, 1 }
   0xf   : > { %p1486_p4 = por %p58_p1, %p57_p0  ;;  %p166_p7 = scmp.lt.s32.totalorder %s1410_s20, 3 }
  0x10   : > { %p1491_p6 = por %p159_p3, %p57_p0  ;;  %s1412_s26 = smov [#allocation8]  }
  0x11   : > { %p1496_p8 = pnand %p984_p5, %p166_p7  ;;  %s178_s27 = sshll.u32 %s1412_s26, 4  ;;  %s179_s27 = int_to_ptr.vmem [resolvable:$true] %s178_s27 }
  0x12   : > { %s1693_s24 = scalar_select %p1491_p6, 1, 0 }
  0x13   : > { %p1082_p9 = pneg %p1496_p8  ;;  %p986_p10 = scmp.ge.s32.totalorder %s1410_s20, 2 }
  0x14   : > { %s35_s29 = sadd.s32 1, %s1406_s19  ;;  %s1251_s30 = scalar_lea.vmem %s179_s27, 6144 }
  0x15   : > { %p1505_p11 = pnand %p1082_p9, %p58_p1  ;;  %p1252_p13 = scmp.ne.s32.totalorder %s179_s27, %s1251_s30 }
  0x16   : > { %p1259_p5 = scmp.lt.s32.totalorder %s179_s27, %s179_s27  ;;  %p1260_p7 = scmp.lt.s32.totalorder %s1251_s30, %s1251_s30 }
  0x17   : > { %p1242_p12 = pneg %p1505_p11 }
  0x18   : > { %p1261_p2 = por %p1260_p7, %p1259_p5 }
  0x19   : > { %p1254_p0 = pnand %p1252_p13, %p1242_p12 }
  0x1b   : > { %p1255_p3 = pneg %p1254_p0 }
  0x1d   : > { %p1262_p6 = pnand %p1261_p2, %p1255_p3 }
  0x1f   : > { %1265 = shalt.err (!%p1262_p6)
}
  0x20   : > { %s1682_s5 = smov 128   ;;  %s1683_s6 = smov 8  }
  0x21   : > { %s1696_s2 = sld [smem:[#allocation19_spill]]  ;;  %p37_p2 = scmp.ge.s32.totalorder %s35_s29, 2 }
  0x22   : > { %s44_s9 = sadd.s32 1, %s1398_s17  ;;  %p51_p6 = scmp.ne.s32.totalorder %s1398_s17, %s1394_s16 }
  0x23   : > { %p52_p9 = scmp.eq.s32.totalorder %s1410_s20, 0  ;;  %s1718_s29 = smov (%p37_p2, %s35_s29), 0 }
  0x24   : > { %1697 = sst [smem:[#allocation16_spill]] %s1718_s29  ;;  %p1699_p13 = scmp.eq.s32.totalorder %s1477_s21, 1 }
  0x25   : > { %p1526_p12 = por %p52_p9, %p51_p6  ;;  %s39_s12 = ssub.s32 %s1406_s19, %s1718_s29 }
  0x26   : > { %p1532_p0 = por %p1699_p13, %p51_p6  ;;  %p42_p3 = scmp.eq.s32.totalorder %s39_s12, 0 }
  0x27   : > { %1085 = dma.hbm_to_vmem [thread:$0]  (!%p1505_p11), %s1696_s2, 6144, %s179_s27, [#allocation7], %s1682_s5, %s1682_s5, %s1683_s6  }
  0x28   : > { %p1098_p11 = scmp.lt.s32.totalorder %s1410_s20, 2  ;;  %s1540_s13 = sand.u32 1, %s1398_s17  }
  0x29   : > { %s987_s14 = sshll.u32 %s1540_s13, 4  ;;  %s1061_s26 = sshll.u32 %s1406_s19, 8 }
  0x2a   : > { %s1544_s22 = scalar_select %p42_p3, %s1398_s17, %s44_s9  }
  0x2b   : > { %s1702_s0 = sld [smem:[#allocation18_spill]]  ;;  %s199_s7 = scalar_lea.vmem [#allocation3], %s987_s14 }
  0x2c   : > { %1701 = sst [smem:[#allocation17_spill]] %s1544_s22  ;;  %s208_s8 = sshll.u32 %s199_s7, 4  ;;  %s209_s8 = int_to_ptr.vmem [resolvable:$true] %s208_s8 }
  0x2d   : > { %p1552_p5 = pnand %p1098_p11, %p1526_p12  ;;  %s218_s12 = sand.u32 1, %s1410_s20  }
  0x2e   : > { %s990_s6 = sshll.u32 %s1540_s13, 1  ;;  %s196_s2 = scalar_lea.sflag [#allocation4], %s1540_s13 }
  0x2f   : > { %p1268_p7 = pneg %p1552_p5  ;;  %s1279_s9 = scalar_lea.vmem %s209_s8, 256 }
  0x30   : > { %p1280_p2 = scmp.ne.s32.totalorder %s209_s8, %s1279_s9  ;;  %s1415_s14 = smov [#allocation3]  }
  0x31   : > { %s207_s30 = scalar_lea.hbm %s1702_s0, %s1061_s26  ;;  %s1284_s26 = sshll.u32 %s1415_s14, 4  ;;  %s1285_s26 = int_to_ptr.vmem [resolvable:$false] %s1284_s26 }
  0x32   : > { %p1282_p6 = pnand %p1280_p2, %p1268_p7  ;;  %s1286_s10 = scalar_lea.vmem %s1285_s26, 512 }
  0x33   : > { %p1287_p12 = scmp.lt.s32.totalorder %s209_s8, %s1285_s26  ;;  %p1288_p13 = scmp.lt.s32.totalorder %s1286_s10, %s1279_s9 }
  0x34   : > { %p1283_p9 = pneg %p1282_p6 }
  0x35   : > { %p1289_p11 = por %p1288_p13, %p1287_p12 }
  0x37   : > { %p1290_p3 = pnand %p1289_p11, %p1283_p9 }
  0x39   : > { %1293 = shalt.err (!%p1290_p3)
}
  0x3a   : > { %s1704_s13 = smov 8   ;;  %s1705_s27 = smov 128  }
  0x3b   : > { %1089 = dma.hbm_to_vmem [thread:$0]  (!%p1552_p5), %s207_s30, 256, %s209_s8, %s196_s2, %s1705_s27, %s1705_s27, %s1704_s13  }
  0x3c   : > { %s991_s28 = sshll.u32 %s1406_s19, 5  ;;  %s222_s29 = scalar_lea.vmem [#allocation6], %s990_s6 }
  0x3d   : > { %s228_s14 = scalar_lea.hbm %s1678_s1, %s991_s28  ;;  %s230_s22 = sshll.u32 %s222_s29, 4  ;;  %s231_s22 = int_to_ptr.vmem [resolvable:$true] %s230_s22 }
  0x3e   : > { %s219_s9 = scalar_lea.sflag [#allocation7], %s218_s12  ;;  %s1307_s26 = scalar_lea.vmem %s231_s22, 32 }
  0x3f   : > { %p1308_p2 = scmp.ne.s32.totalorder %s231_s22, %s1307_s26  ;;  %s1416_s10 = smov [#allocation6]  }
  0x40   : > { %s1312_s17 = sshll.u32 %s1416_s10, 4  ;;  %s1313_s17 = int_to_ptr.vmem [resolvable:$false] %s1312_s17 }
  0x41   : > { %p1310_p6 = pnand %p1308_p2, %p1268_p7  ;;  %s1314_s20 = scalar_lea.vmem %s1313_s17, 64 }
  0x42   : > { %p1315_p12 = scmp.lt.s32.totalorder %s231_s22, %s1313_s17  ;;  %p1316_p13 = scmp.lt.s32.totalorder %s1314_s20, %s1307_s26 }
  0x43   : > { %p1311_p9 = pneg %p1310_p6 }
  0x44   : > { %p1317_p11 = por %p1316_p13, %p1315_p12 }
  0x46   : > { %p1318_p3 = pnand %p1317_p11, %p1311_p9 }
  0x48   : > { %1321 = shalt.err (!%p1318_p3)
}
  0x49   : > { %1092 = dma.hbm_to_vmem [thread:$0]  (!%p1552_p5), %s228_s14, 32, %s231_s22, %s219_s9  }
  0x4a   : > { %239 = sbr.rel (%p1496_p8) target bundleno = 402 (0x192), region = 36  ;;  %s1581_s0 = sand.u32 (!%p1496_p8), 1, %s1394_s16  }
  0x4b   : > { %s993_s2 = sshll.u32 (!%p1496_p8), %s1581_s0, 4  ;;  %s242_s29 = scalar_lea.sflag (!%p1496_p8), [#allocation4], %s1581_s0 }
  0x4c   : > { %s1587_s17 = scalar_lea.vmem (!%p1496_p8), [#allocation3], %s993_s2 }
  0x4f   : > { %1373 = dma.done.wait (%p1486_p4), %s242_s29, 256  }
  0x50   : > { %1375 = vsyncadd (%p1486_p4), %s242_s29, 4294967040  ;;  %s250_s20 = sand.u32 1, %s1477_s21   ;;  %s994_s25 = sshll.u32 %s1581_s0, 1 }
  0x51   : > { %s251_s5 = scalar_lea.sflag [#allocation7], %s250_s20  ;;  %s1595_s6 = scalar_lea.vmem [#allocation6], %s994_s25 }
  0x52   : > { %1377 = dma.done.wait (%p1486_p4), %s251_s5, 32  }
  0x53   : > { %1379 = vsyncadd (%p1486_p4), %s251_s5, 4294967264 }
  0x54   : > { %1381 = dma.done.wait (%p58_p1), [#allocation7], 6144  }
  0x55   : > { %1383 = vsyncadd (%p58_p1), [#allocation7], 4294961152  ;;  %v1417_v0 = vmov 0   ;;  %v1155_v1 = vld [vmem:[#allocation8 + $0x74] ss:$8 sps:$4 sm:$0xff]   ;;  %vm313_vm0 = vcmask 1043459  }
  0x56   : > { %500 = vmatprep.mubr.bf16.mxu0 %v1417_v0  ;;  %646 = vmatprep.mubr.bf16.mxu1 %v1417_v0  ;;  %v1157_v2 = vld [vmem:[#allocation8 + $0x70] ss:$8 sps:$4 sm:$0xff]   ;;  %v1158_v3 = vld [vmem:[#allocation8 + $0xf4] ss:$8 sps:$4 sm:$0xff]   ;;  %v1161_v5 = vld [vmem:[#allocation8 + $0x64] ss:$8 sps:$4 sm:$0xff]  }
  0x57   : > { %468 = vmatprep.subr.bf16.mxu0 %v1155_v1  ;;  %v1160_v4 = vld [vmem:[#allocation8 + $0xf0] ss:$8 sps:$4 sm:$0xff]   ;;  %v1163_v6 = vld [vmem:[#allocation8 + $0x60] ss:$8 sps:$4 sm:$0xff]   ;;  %614 = vmatprep.subr.bf16.mxu1 %v1158_v3  ;;  %v1164_v7 = vld [vmem:[#allocation8 + $0xe4] ss:$8 sps:$4 sm:$0xff]  }
  0x58   : > { %469 = vmatpush1.bf16.msra.mxu0 %v1157_v2  ;;  %615 = vmatpush1.bf16.msra.mxu1 %v1160_v4  ;;  %v1166_v8 = vld [vmem:[#allocation8 + $0xe0] ss:$8 sps:$4 sm:$0xff]   ;;  %v1167_v9 = vld [vmem:[#allocation8 + $0x54] ss:$8 sps:$4 sm:$0xff]   ;;  %v1169_v10 = vld [vmem:[#allocation8 + $0x50] ss:$8 sps:$4 sm:$0xff]  }
  0x59   : > { %470 = vmatprep.subr.bf16.mxu0 %v1161_v5  ;;  %616 = vmatprep.subr.bf16.mxu1 %v1164_v7  ;;  %v1170_v11 = vld [vmem:[#allocation8 + $0xd4] ss:$8 sps:$4 sm:$0xff]   ;;  %v1173_v12 = vld [vmem:[#allocation8 + $0x44] ss:$8 sps:$4 sm:$0xff]   ;;  %v1172_v13 = vld [vmem:[#allocation8 + $0xd0] ss:$8 sps:$4 sm:$0xff]  }
  0x5a   : > { %v1176_v14 = vld [vmem:[#allocation8 + $0xc4] ss:$8 sps:$4 sm:$0xff]   ;;  %v1175_v15 = vld [vmem:[#allocation8 + $0x40] ss:$8 sps:$4 sm:$0xff]   ;;  %v1179_v16 = vld [vmem:[#allocation8 + $0x34] ss:$8 sps:$4 sm:$0xff]  }
  0x5b   : > { %v1178_v17 = vld [vmem:[#allocation8 + $0xc0] ss:$8 sps:$4 sm:$0xff]   ;;  %v1182_v18 = vld [vmem:[#allocation8 + $0xb4] ss:$8 sps:$4 sm:$0xff]   ;;  %v1181_v19 = vld [vmem:[#allocation8 + $0x30] ss:$8 sps:$4 sm:$0xff]  }
  0x5c   : > { %471 = vmatpush1.bf16.msra.mxu0 %v1163_v6  ;;  %617 = vmatpush1.bf16.msra.mxu1 %v1166_v8  ;;  %v1185_v20 = vld [vmem:[#allocation8 + $0x24] ss:$8 sps:$4 sm:$0xff]   ;;  %v1184_v21 = vld [vmem:[#allocation8 + $0xb0] ss:$8 sps:$4 sm:$0xff]   ;;  %v1187_v23 = vld [vmem:[#allocation8 + $0x20] ss:$8 sps:$4 sm:$0xff]  }
  0x5d   : > { %472 = vmatprep.subr.bf16.mxu0 %v1167_v9  ;;  %618 = vmatprep.subr.bf16.mxu1 %v1170_v11  ;;  %v1188_v22 = vld [vmem:[#allocation8 + $0xa4] ss:$8 sps:$4 sm:$0xff]   ;;  %v1191_v24 = vld [vmem:[#allocation8 + $0x14] ss:$8 sps:$4 sm:$0xff]   ;;  %vm314_vm1 = vsmask.f32 7950 }
  0x5e   : > { %v1190_v25 = vld [vmem:[#allocation8 + $0xa0] ss:$8 sps:$4 sm:$0xff]   ;;  %v1194_v28 = vld [vmem:[#allocation8 + $0x94] ss:$8 sps:$4 sm:$0xff]   ;;  %v1193_v31 = vld [vmem:[#allocation8 + $0x10] ss:$8 sps:$4 sm:$0xff]  }
  0x5f   : > { %v291_v26 = vld [vmem:[%s1587_s17] sm:$0xff]  ;;  %v292_v27 = vld [vmem:[%s1587_s17 + $0x8] sm:$0xff]  ;;  %vm1611_vm2 = vmand %vm313_vm0, %vm314_vm1  ;;  %vm324_vm3 = vcmask 1040384   ;;  %vm325_vm4 = vsmask.f32 256  ;;  %s1065_s22 = sshll.u32 %s1402_s18, 8 }
  0x60   : > { %473 = vmatpush1.bf16.msra.mxu0 %v1169_v10  ;;  %619 = vmatpush1.bf16.msra.mxu1 %v1172_v13  ;;  %v1069_v29 = vpack.c.bf16 %v292_v27, %v291_v26  ;;  %v303_v30 = vld [vmem:[%s1595_s6] sm:$0x3]  ;;  %v1197_v34 = vld [vmem:[#allocation8 + $0x4] ss:$8 sps:$4 sm:$0xff]   ;;  %v1196_v35 = vld [vmem:[#allocation8 + $0x90] ss:$8 sps:$4 sm:$0xff]   ;;  %s1627_s27 = scalar_lea.hbm %s1681_s4, %s1065_s22 }
  0x61   : > { %474 = vmatprep.subr.bf16.mxu0 %v1173_v12  ;;  %620 = vmatprep.subr.bf16.mxu1 %v1176_v14  ;;  %v1064_v32 = vpack.c.bf16 %v303_v30, %v303_v30  ;;  %v1200_v37 = vld [vmem:[#allocation8 + $0x84] ss:$8 sps:$4 sm:$0xff]   ;;  %v316_v38 = vld [vmem:[#allocation2 + $0x4] sm:$0x8]  ;;  %v1207_v41 = vld [vmem:[#allocation8 + $0x174] ss:$8 sps:$4 sm:$0xff]  }
  0x62   : > { %1071 = vst [vmem:[#allocation2 + $0x8] sm:$0xff] %v1069_v29   ;;  %v1199_v39 = vld [vmem:[#allocation8] ss:$8 sps:$4 sm:$0xff]   ;;  %vm326_vm5 = vmand %vm324_vm3, %vm325_vm4  ;;  %v327_v51 = vld [vmem:[#allocation2 + $0x10] sm:$0x1]  ;;  %s287_s30 = scalar_lea.vmem [#allocation9], %s993_s2 }
  0x63   : > { %v309_v36 = vshll.u32 %v1064_v32, 16  ;;  %v1202_v42 = vld [vmem:[#allocation8 + $0x80] ss:$8 sps:$4 sm:$0xff]   ;;  %v319_v46 = vshrl.u32 %v1064_v32, 16  ;;  %vm369_vm6 = vsmask.f32 4352 }
  0x64   : > { %475 = vmatpush1.bf16.msra.mxu0 %v1175_v15  ;;  %621 = vmatpush1.bf16.msra.mxu1 %v1178_v17  ;;  %v1205_v63 = vld [vmem:[#allocation8 + $0x170] ss:$8 sps:$4 sm:$0xff]   ;;  %v1211_v1 = vld [vmem:[#allocation8 + $0x164] ss:$8 sps:$4 sm:$0xff]   ;;  %v1209_v3 = vld [vmem:[#allocation8 + $0x160] ss:$8 sps:$4 sm:$0xff]  }
  0x65   : > { %476 = vmatprep.subr.bf16.mxu0 %v1179_v16  ;;  %622 = vmatprep.subr.bf16.mxu1 %v1182_v18  ;;  %v311_v40 = vrot.slane %v309_v36, 5  ;;  %v328_v52 = vsel %vm326_vm5, %v319_v46, %v327_v51  ;;  %v1214_v4 = vld [vmem:[#allocation8 + $0x154] ss:$8 sps:$4 sm:$0xff]   ;;  %v1212_v5 = vld [vmem:[#allocation8 + $0x150] ss:$8 sps:$4 sm:$0xff]   ;;  %s862_s8 = sshll.u32 %s287_s30, 4  ;;  %s1629_s8 = int_to_ptr.vmem [resolvable:$true] %s862_s8 }
  0x66   : > { %329 = vst [vmem:[#allocation2 + $0x10] sm:$0x1] %v328_v52  ;;  %v1217_v6 = vld [vmem:[#allocation8 + $0x144] ss:$8 sps:$4 sm:$0xff]   ;;  %v1215_v7 = vld [vmem:[#allocation8 + $0x140] ss:$8 sps:$4 sm:$0xff]  }
  0x67   : > { %v317_v43 = vsel %vm1611_vm2, %v311_v40, %v316_v38  ;;  %v1220_v8 = vld [vmem:[#allocation8 + $0x134] ss:$8 sps:$4 sm:$0xff]   ;;  %v1218_v9 = vld [vmem:[#allocation8 + $0x130] ss:$8 sps:$4 sm:$0xff]   ;;  %v1223_v11 = vld [vmem:[#allocation8 + $0x124] ss:$8 sps:$4 sm:$0xff]  }
  0x68   : > { %477 = vmatpush1.bf16.msra.mxu0 %v1181_v19  ;;  %623 = vmatpush1.bf16.msra.mxu1 %v1184_v21  ;;  %318 = vst [vmem:[#allocation2 + $0x4] sm:$0x8] %v317_v43  ;;  %v1221_v12 = vld [vmem:[#allocation8 + $0x120] ss:$8 sps:$4 sm:$0xff]   ;;  %v1224_v15 = vld [vmem:[#allocation8 + $0x110] ss:$8 sps:$4 sm:$0xff]  }
  0x69   : > { %478 = vmatprep.subr.bf16.mxu0 %v1185_v20  ;;  %624 = vmatprep.subr.bf16.mxu1 %v1188_v22  ;;  %v343_v44 = vld [vmem:[#allocation2 + $0x8] sm:$0xf]  ;;  %v344_v45 = vld [vmem:[#allocation2 + $0xc] sm:$0xf]  ;;  %v1227_v20 = vld [vmem:[#allocation8 + $0x100] ss:$8 sps:$4 sm:$0xff]  }
  0x6a   : > { %v1002_v47 = vcombine.low %v344_v45, %v344_v45  ;;  %v1019_v48 = vcombine.low %v343_v44, %v344_v45  ;;  %v1230_v10 = vld [vmem:[#allocation2 + $0x8] sm:$0xff]   ;;  %vm689_vm7 = vsmask.f32 7424  ;;  %s847_s28 = scalar_lea.sflag [#allocation5], %s1581_s0  ;;  %s1322_s18 = scalar_lea.vmem %s1629_s8, 256 }
  0x6b   : > { %v693_v14 = vshll.u32 %v1230_v10, 16  ;;  %v691_v16 = vshrl.u32 %v1230_v10, 16  ;;  %v1229_v19 = vld [vmem:[#allocation8 + $0x104] ss:$8 sps:$4 sm:$0xff]   ;;  %p1323_p1 = scmp.ne.s32.totalorder %s1629_s8, %s1322_s18  ;;  %s1418_s7 = smov [#allocation9]  }
  0x6c   : > { %479 = vmatpush1.bf16.msra.mxu0 %v1187_v23  ;;  %625 = vmatpush1.bf16.msra.mxu1 %v1190_v25  ;;  %v379_v49 = vshrl.u32 %v1002_v47, 16  ;;  %v382_v50 = vshll.u32 %v1002_v47, 16  ;;  %s1326_s14 = sshll.u32 %s1418_s7, 4  ;;  %s1327_s14 = int_to_ptr.vmem [resolvable:$false] %s1326_s14 }
  0x6d   : > { %480 = vmatprep.subr.bf16.mxu0 %v1191_v24  ;;  %626 = vmatprep.subr.bf16.mxu1 %v1194_v28  ;;  %v1231_v13 = vld [vmem:[#allocation2 + $0x10] ss:$0 sps:$4 sm:$0x11]   ;;  %v695_v17 = vrot.slane %v693_v14, 1  ;;  %v332_v24 = vlaneseq  ;;  %v330_v28 = vld [vmem:[%s1680_s3] sm:$0x3]  ;;  %p1324_p4 = pnand %p1323_p1, %p1532_p0  ;;  %p1329_p5 = scmp.lt.s32.totalorder %s1629_s8, %s1327_s14 }
  0x6e   : > { %v381_v55 = vrot.slane %v379_v49, 3  ;;  %v384_v56 = vrot.slane %v382_v50, 4  ;;  %v698_v18 = vshll.u32 %v1231_v13, 16  ;;  %s1328_s9 = scalar_lea.vmem %s1327_s14, 512 }
  0x6f   : > { %v342_v53 = vld [vmem:[#allocation2 + $0x4] sm:$0x8]  ;;  %v696_v21 = vor.u32 %v695_v17, %v691_v16  ;;  %v333_v25 = vshrl.u32 %v332_v24, 7  ;;  %p1325_p8 = pneg %p1324_p4  ;;  %p1330_p7 = scmp.lt.s32.totalorder %s1328_s9, %s1322_s18 }
  0x70   : > { %481 = vmatpush1.bf16.msra.mxu0 %v1193_v31  ;;  %627 = vmatpush1.bf16.msra.mxu1 %v1196_v35  ;;  %v1001_v54 = vcombine.low %v342_v53, %v343_v44  ;;  %v385_v61 = vor.u32 %v384_v56, %v381_v55  ;;  %v700_v22 = vrot.slane %v698_v18, 1 }
  0x71   : > { %482 = vmatprep.subr.bf16.mxu0 %v1197_v34  ;;  %628 = vmatprep.subr.bf16.mxu1 %v1200_v37  ;;  %v338_v27 = vsub.s32 1, %v333_v25  ;;  %v334_v50 = vsub.s32 0, %v333_v25  ;;  %p1331_p2 = por %p1330_p7, %p1329_p5 }
  0x72   : > { %v371_v57 = vshrl.u32 %v1001_v54, 16  ;;  %v374_v58 = vshll.u32 %v1001_v54, 16  ;;  %v701_v23 = vsel %vm689_vm7, %v696_v21, %v700_v22 }
  0x73   : > { %v339_v31 = vrot.slane %v330_v28, %v338_v27  ;;  %v335_v53 = vrot.slane %v330_v28, %v334_v50  ;;  %p1332_p6 = pnand %p1331_p2, %p1325_p8 }
  0x74   : > { %483 = vmatpush1.bf16.msra.mxu0 %v1199_v39  ;;  %629 = vmatpush1.bf16.msra.mxu1 %v1202_v42  ;;  %v373_v59 = vrot.slane %v371_v57, 3  ;;  %v376_v60 = vrot.slane %v374_v58, 4 }
  0x75   : > { %783 = vmatprep.subr.bf16.mxu0 %v1207_v41 }
  0x76   : > { %v377_v62 = vor.u32 %v376_v60, %v373_v59 }
  0x77   : > { %647 = vmatmul.mubr.bf16.vlgmr.msra.gmra.mxu1 %v1019_v48 }
  0x78   : > { %v386_v2 = vsel %vm369_vm6, %v377_v62, %v385_v61 }
  0x79   : > { %501 = vmatmul.mubr.bf16.vlgmr.msra.gmra.mxu0 %v386_v2 }
  0x7a   : > { %784 = vmatpush1.bf16.msra.mxu0 %v1205_v63  ;;  %815 = vmatprep.mubr.bf16.mxu0 %v1417_v0  ;;  %v1226_v0 = vld [vmem:[#allocation8 + $0x114] ss:$8 sps:$4 sm:$0xff]  }
  0x7b   : > { %785 = vmatprep.subr.bf16.mxu0 %v1211_v1 }
  0x7e   : > { %786 = vmatpush1.bf16.msra.mxu0 %v1209_v3 }
  0x7f   : > { %787 = vmatprep.subr.bf16.mxu0 %v1214_v4 }
  0x82   : > { %788 = vmatpush1.bf16.msra.mxu0 %v1212_v5 }
  0x83   : > { %789 = vmatprep.subr.bf16.mxu0 %v1217_v6 }
  0x86   : > { %790 = vmatpush1.bf16.msra.mxu0 %v1215_v7 }
  0x87   : > { %791 = vmatprep.subr.bf16.mxu0 %v1220_v8 }
  0x8a   : > { %792 = vmatpush1.bf16.msra.mxu0 %v1218_v9 }
  0x8b   : > { %793 = vmatprep.subr.bf16.mxu0 %v1223_v11 }
  0x8e   : > { %794 = vmatpush1.bf16.msra.mxu0 %v1221_v12 }
  0x8f   : > { %795 = vmatprep.subr.bf16.mxu0 %v1226_v0 }
  0x92   : > { %796 = vmatpush1.bf16.msra.mxu0 %v1224_v15 }
  0x93   : > { %797 = vmatprep.subr.bf16.mxu0 %v1229_v19 }
  0x96   : > { %798 = vmatpush1.bf16.msra.mxu0 %v1227_v20 }
  0x99   : > { %816 = vmatmul.mubr.bf16.vlgmr.msra.gmra.mxu0 %v701_v23 }
 0x137   : > { %v648_v30 = vpop.f32.mrf.mxu1 }
 0x139   : > { %v502_v26 = vpop.f32.mrf.mxu0  ;;  %v650_v33 = vpop.f32.mrf.mxu1 }
 0x13a   : > { %v511_v55 = vadd.f32 %v502_v26, %v335_v53 }
 0x13b   : > { %v504_v29 = vpop.f32.mrf.mxu0  ;;  %v652_v36 = vpop.f32.mrf.mxu1 }
 0x13c   : > { %v512_v34 = vadd.f32 %v504_v29, %v339_v31  ;;  %v657_v56 = vadd.f32 %v648_v30, %v511_v55 }
 0x13d   : > { %v506_v32 = vpop.f32.mrf.mxu0  ;;  %v654_v40 = vpop.f32.mrf.mxu1 }
 0x13e   : > { %v658_v38 = vadd.f32 %v650_v33, %v512_v34  ;;  %v513_v57 = vadd.f32 %v506_v32, %v335_v53 }
 0x13f   : > { %v508_v35 = vpop.f32.mrf.mxu0 }
 0x140   : > { %v514_v39 = vadd.f32 %v508_v35, %v339_v31  ;;  %v659_v60 = vadd.f32 %v652_v36, %v513_v57 }
 0x142   : > { %v660_v44 = vadd.f32 %v654_v40, %v514_v39 }
 0x159   : > { %v817_v37 = vpop.f32.mrf.mxu0 }
 0x15a   : > { %v826_v58 = vadd.f32 %v817_v37, %v657_v56 }
 0x15b   : > { %v819_v41 = vpop.f32.mrf.mxu0 }
 0x15c   : > { %v827_v42 = vadd.f32 %v819_v41, %v658_v38 }
 0x15d   : > { %v821_v43 = vpop.f32.mrf.mxu0 }
 0x15e   : > { %v1054_v45 = vmul.f32 -1.442695, %v827_v42  ;;  %v828_v62 = vadd.f32 %v821_v43, %v659_v60 }
 0x15f   : > { %v823_v46 = vpop.f32.mrf.mxu0 }
 0x160   : > { %1232 = vpow2.f32 %v1054_v45  ;;  %v829_v47 = vadd.f32 %v823_v46, %v660_v44 }
 0x162   : > { %v1055_v48 = vmul.f32 -1.442695, %v829_v47 }
 0x164   : > { %1234 = vpow2.f32 %v1055_v48 }
 0x16d   : > { %v1233_v49 = vpop.eup %1232 }
 0x16e   : > { %v836_v51 = vadd.f32 1.0, %v1233_v49 }
 0x170   : > { %1236 = vrcp.f32 %v836_v51 }
 0x171   : > { %v1235_v52 = vpop.eup %1234 }
 0x172   : > { %v837_v54 = vadd.f32 1.0, %v1235_v52 }
 0x174   : > { %1238 = vrcp.f32 %v837_v54 }
 0x17d   : > { %v1237_v59 = vpop.eup %1236 }
 0x17e   : > { %v842_v61 = vmul.f32 %v1237_v59, %v826_v58 }
 0x180   : > { %844 = vst [vmem:[%s287_s30] sm:$0xff] %v842_v61 }
 0x181   : > { %v1239_v63 = vpop.eup %1238 }
 0x182   : > { %v843_v1 = vmul.f32 %v1239_v63, %v828_v62 }
 0x184   : > { %845 = vst [vmem:[%s287_s30 + $0x8] sm:$0xff] %v843_v1 }
 0x185   : > { %1335 = shalt.err (!%p1332_p6)
}
 0x186   : > { %s1336_s26 = scalar_lea.hbm %s1627_s27, 256  ;;  %s1340_s29 = scalar_lea.hbm %s1681_s4, 512 }
 0x187   : > { %p1337_p9 = scmp.ne.s32.totalorder %s1627_s27, %s1336_s26  ;;  %p1341_p11 = scmp.lt.s32.totalorder %s1627_s27, %s1681_s4 }
 0x188   : > { %p1342_p3 = scmp.lt.s32.totalorder %s1340_s29, %s1336_s26 }
 0x189   : > { %p1338_p12 = pnand %p1337_p9, %p1532_p0 }
 0x18a   : > { %p1343_p1 = por %p1342_p3, %p1341_p11 }
 0x18b   : > { %p1339_p13 = pneg %p1338_p12 }
 0x18d   : > { %p1344_p4 = pnand %p1343_p1, %p1339_p13 }
 0x18f   : > { %1347 = shalt.err (!%p1344_p4)
}
 0x190   : > { %s1419_s25 = smov 128   ;;  %s1420_s5 = smov 8  }
 0x191   : > { %1080 = dma.vmem_to_hbm [thread:$0]  (%p1532_p0), %s1629_s8, 256, %s1627_s27, %s847_s28, %s1419_s25, %s1419_s25, %s1420_s5  }
 0x192 PF: > { %s1708_s6 = sld [smem:[#allocation15_spill]]  ;;  %s877_s21 = sand.u32 1, %s1390_s15  }
 0x193   : > { %p1709_p8 = scmp.ne.s32.totalorder %s1693_s24, 0  ;;  %s878_s23 = scalar_lea.sflag [#allocation5], %s877_s21 }
 0x195   : > { %p1094_p5 = pnand %p986_p10, %p1709_p8 }
 0x197   : > { %p1095_p7 = pneg %p1094_p5 }
 0x199   : > { %1385 = dma.done.wait (%p1095_p7), %s878_s23, 256  }
 0x19a   : > { %1387 = vsyncadd (%p1095_p7), %s878_s23, 4294967040  ;;  %s23_s20 = sadd.s32 1, %s1708_s6   ;;  %s1710_s22 = sld [smem:[#allocation14_spill]] }
 0x19b   : > { %p20_p2 = scmp.ge.s32.totalorder %s23_s20, 4   ;;  %s1711_s17 = sld [smem:[#allocation17_spill]] }
 0x19c   : > { %s1712_s11 = sld [smem:[#allocation16_spill]]  ;;  %s1713_s15 = smov %s1394_s16 }
 0x19d   : > { %s1715_s18 = smov %s1406_s19 }
 0x19e   :  { %22 = sbr.rel (!%p20_p2) target bundleno = 11 (0xb), region = 100 }
 0x1a0   : > { %s1714_s16 = smov %s1710_s22 }
 0x1a2   : > { %s1716_s19 = smov %s1712_s11 }
 0x1a3   :  { %883 = vsyncpa [#allocation4], 1 }
 0x1a4   :  { %885 = vsyncpa [#allocation4 + $0x1], 1 }
 0x1a5   :  { %886 = vsyncpa [#allocation7], 1 }
 0x1a6   :  { %888 = vsyncpa [#allocation7 + $0x1], 1 }
 0x1a7   :  { %889 = vsyncpa [#allocation5], 1 }
 0x1a8   :  { %891 = vsyncpa [#allocation5 + $0x1], 1 }

</bundles_post_ra>
